<compile_context>
chip_gen: v7x
topology: tpu7x:2x2x1
jax: 0.10.0
libtpu: 0.0.40
codegen_flags: <defaults>
</compile_context>

<pallas_src>
import jax
import jax.numpy as jnp
from jax.experimental import pallas as pl
from jax.experimental.pallas import tpu as pltpu


def _decompress_kernel(x_ref, w_ref, b_ref, y_ref):
    # x_ref: (TB, C, tile_hw)   w_ref: (2C, C)   b_ref: (2C, 1) f32   y_ref: (TB, 2C, tile_hw)
    w = w_ref[...]
    b = b_ref[...]
    for f in range(x_ref.shape[0]):          # TB is static and small -> fully unrolled
        acc = jnp.dot(w, x_ref[f], preferred_element_type=jnp.float32)
        y_ref[f] = (acc + b).astype(y_ref.dtype)


def _vmem_plan(C, itemsize):
    """(vmem_limit_bytes, block_budget_bytes) sized per TPU generation."""
    try:
        cap = int(getattr(pltpu.get_tpu_info(), "vmem_capacity_bytes", 64 << 20))
    except Exception:  # query unavailable (e.g. interpret mode) -> conservative default
        cap = 64 << 20
    # Scoped VMEM limit we request (headroom left for compiler scratch):
    #   v5e/v6e (128 MiB physical) -> 100 MiB, v7x (64 MiB physical) -> 56 MiB.
    vmem_limit = int(max(32 << 20, min(cap - (8 << 20), 100 << 20)))
    # Budget for the double-buffered x/y blocks; the (also double-buffered) fused
    # weight + bias is resident for the whole kernel, so subtract it explicitly.
    weight_resident = 2 * (2 * C * C * itemsize + 2 * C * 4)
    block_budget = min(int(vmem_limit * 0.6), 48 << 20) - weight_resident
    return vmem_limit, max(block_budget, 1 << 20)


def _choose_tiling(bt, C, HW, itemsize, block_budget_bytes):
    """Pick (frames_per_step TB, tile_hw)."""
    col_bytes = 6 * C * itemsize            # 2x double-buffered: input (C) + output (2C) rows
    max_cols = max(128, block_budget_bytes // col_bytes)

    if HW <= max_cols:
        tile_hw = HW                        # full-extent lane block (always legal)
    else:
        # Largest 128-multiple within budget, capped (prefer more frames over a giant tile).
        tile_hw = max(128, (min(max_cols, 2048) // 128) * 128)

    # Frames per grid step: fill the remaining budget, cap the static unroll, and keep
    # TB a divisor of bt so the leading grid axis needs no partial blocks.
    tb_cap = int(max(1, min(bt, max_cols // tile_hw, 8)))
    tb = 1
    for d in range(tb_cap, 0, -1):
        if bt % d == 0:
            tb = d
            break
    return tb, tile_hw


def decompress_temporal(x_nchw, weight, bias, bs, *, compute_dtype=None,
                        block_budget_bytes=None):
    """x_nchw: (bs*t, C, H, W); weight: (C_in, C_out, 2, 1, 1); bias: (C_out,).

    compute_dtype: optional narrower dtype (e.g. jnp.bfloat16) for x / weights inside the
    kernel (accumulation stays f32, output keeps the input dtype) -- near-2x for this
    HBM-bound kernel when tolerances allow.
    """
    bt, C, H, W = x_nchw.shape
    assert bt % bs == 0
    assert weight.shape == (C, C, 2, 1, 1), weight.shape
    t = bt // bs
    HW = H * W
    out_dtype = x_nchw.dtype
    in_dtype = jnp.dtype(compute_dtype) if compute_dtype is not None else out_dtype
    itemsize = jnp.dtype(in_dtype).itemsize

    # Free reshape, NCHW layout preserved (no transpose, no pad).
    x3 = x_nchw.reshape(bt, C, HW).astype(in_dtype)

    # Fused weight: row index = k*C + co  ->  (2C, C).  One-time tiny transpose.
    w = weight[:, :, :, 0, 0]                                        # (Ci, Co, 2)
    w_fused = jnp.transpose(w, (2, 1, 0)).reshape(2 * C, C).astype(in_dtype)
    b_fused = jnp.concatenate([bias, bias]).reshape(2 * C, 1).astype(jnp.float32)

    vmem_limit, auto_budget = _vmem_plan(C, itemsize)
    budget = auto_budget if block_budget_bytes is None else block_budget_bytes
    tb, tile_hw = _choose_tiling(bt, C, HW, itemsize, budget)
    grid = (bt // tb, pl.cdiv(HW, tile_hw))

    flops = 4 * bt * HW * C * C                                      # 2 taps * 2 (MAC)
    bytes_accessed = (bt * C * HW * itemsize
                      + bt * 2 * C * HW * jnp.dtype(out_dtype).itemsize
                      + 2 * C * C * itemsize + 2 * C * 4)

    y3 = pl.pallas_call(
        _decompress_kernel,
        out_shape=jax.ShapeDtypeStruct((bt, 2 * C, HW), out_dtype),
        grid=grid,
        in_specs=[
            pl.BlockSpec((tb, C, tile_hw), lambda i, j: (i, 0, j)),     # x block
            pl.BlockSpec((2 * C, C), lambda i, j: (0, 0)),              # fused weight
            pl.BlockSpec((2 * C, 1), lambda i, j: (0, 0)),              # fused bias
        ],
        out_specs=pl.BlockSpec((tb, 2 * C, tile_hw), lambda i, j: (i, 0, j)),
        compiler_params=pltpu.CompilerParams(
            dimension_semantics=("parallel", "parallel"),
            vmem_limit_bytes=vmem_limit),
        cost_estimate=pl.CostEstimate(
            flops=flops, transcendentals=0, bytes_accessed=bytes_accessed),
    )(x3, w_fused, b_fused)

    # Free reshapes: (bt, 2C, HW) -> (bs, t, 2, C, H, W) -> (bs*2t, C, H, W).
    # Output frame index = 2*t_idx + k, matching ConvTranspose3d stride-2 placement.
    return y3.reshape(bs, t, 2, C, H, W).reshape(bs * 2 * t, C, H, W)


def _reference(x_nchw, weight, bias, bs):
    """Plain-JAX reference of ConvTranspose3d((2,1,1), stride=(2,1,1))."""
    bt, C, H, W = x_nchw.shape
    t = bt // bs
    x = x_nchw.reshape(bs, t, C, H, W)                       # (b, t, ci, h, w)
    w = weight[:, :, :, 0, 0]                                # (ci, co, k)
    y = jnp.einsum('btihw,iok->btkohw', x, w) + bias[None, None, None, :, None, None]
    return y.reshape(bs * 2 * t, C, H, W)


if __name__ == "__main__":
    key = jax.random.PRNGKey(0)

    # Test 1: bs=2, t=4, C=8, H=W=16 (lane-aligned H*W, all frames in one grid step).
    bs, t, C, H, W = 2, 4, 8, 16, 16
    k1, k2, k3 = jax.random.split(key, 3)
    x = jax.random.normal(k1, (bs * t, C, H, W), dtype=jnp.float32)
    weight = jax.random.normal(k2, (C, C, 2, 1, 1), dtype=jnp.float32) * 0.1
    bias = jax.random.normal(k3, (C,), dtype=jnp.float32) * 0.1

    out = jax.block_until_ready(decompress_temporal(x, weight, bias, bs))
    ref = _reference(x, weight, bias, bs)
    assert out.shape == (bs * 2 * t, C, H, W), out.shape
    assert jnp.allclose(out, ref, atol=1e-4, rtol=1e-4), float(jnp.max(jnp.abs(out - ref)))

    # Test 2: non-lane-aligned H*W (full-extent lane block path).
    bs2, t2, C2, H2, W2 = 1, 3, 8, 5, 7
    k4, k5, k6 = jax.random.split(jax.random.PRNGKey(1), 3)
    x2 = jax.random.normal(k4, (bs2 * t2, C2, H2, W2), dtype=jnp.float32)
    w2 = jax.random.normal(k5, (C2, C2, 2, 1, 1), dtype=jnp.float32) * 0.1
    b2 = jax.random.normal(k6, (C2,), dtype=jnp.float32) * 0.1
    out2 = jax.block_until_ready(decompress_temporal(x2, w2, b2, bs2))
    ref2 = _reference(x2, w2, b2, bs2)
    assert out2.shape == (bs2 * 2 * t2, C2, H2, W2), out2.shape
    assert jnp.allclose(out2, ref2, atol=1e-4, rtol=1e-4), float(jnp.max(jnp.abs(out2 - ref2)))

    # Test 3: force a small block budget to exercise cdiv tiling with a partial trailing
    # H*W block (HW=384, tile_hw=256 -> grid_hw=2, second block partially out of bounds).
    bs3, t3, C3, H3, W3 = 1, 2, 8, 16, 24
    k7, k8, k9 = jax.random.split(jax.random.PRNGKey(2), 3)
    x3 = jax.random.normal(k7, (bs3 * t3, C3, H3, W3), dtype=jnp.float32)
    w3 = jax.random.normal(k8, (C3, C3, 2, 1, 1), dtype=jnp.float32) * 0.1
    b3 = jax.random.normal(k9, (C3,), dtype=jnp.float32) * 0.1
    out3 = jax.block_until_ready(
        decompress_temporal(x3, w3, b3, bs3, block_budget_bytes=6 * C3 * 4 * 300))
    ref3 = _reference(x3, w3, b3, bs3)
    assert out3.shape == (bs3 * 2 * t3, C3, H3, W3), out3.shape
    assert jnp.allclose(out3, ref3, atol=1e-4, rtol=1e-4), float(jnp.max(jnp.abs(out3 - ref3)))

    print("KERNEL_OK")
</pallas_src>

<mosaic_0001>
module attributes {stable_mosaic.version = 11 : i64} {
  func.func @_decompress_kernel(%arg0: i32, %arg1: i32, %arg2: memref<8x8x256xf32, #tpu.memory_space<vmem>>, %arg3: memref<16x8xf32, #tpu.memory_space<vmem>>, %arg4: memref<16x1xf32, #tpu.memory_space<vmem>>, %arg5: memref<8x16x256xf32, #tpu.memory_space<vmem>>) attributes {dimension_semantics = [#tpu.dimension_semantics<parallel>, #tpu.dimension_semantics<parallel>], iteration_bounds = array<i64: 1, 1>, scalar_prefetch = 0 : i64, scratch_operands = 0 : i64, tpu.core_type = #tpu.core_type<tc>, window_params = [{transform_indices = @transform_0, window_bounds = array<i64: 8, 8, 256>}, {pipeline_mode = #tpu.pipeline_mode<synchronous>, transform_indices = @transform_1, window_bounds = array<i64: 16, 8>}, {pipeline_mode = #tpu.pipeline_mode<synchronous>, transform_indices = @transform_2, window_bounds = array<i64: 16, 1>}, {transform_indices = @transform_3, window_bounds = array<i64: 8, 16, 256>}]} {
    %c0 = arith.constant 0 : index
    %c0_0 = arith.constant 0 : index
    %0 = vector.load %arg3[%c0, %c0_0] : memref<16x8xf32, #tpu.memory_space<vmem>>, vector<16x8xf32>
    %c0_1 = arith.constant 0 : index
    %c0_2 = arith.constant 0 : index
    %1 = vector.load %arg4[%c0_1, %c0_2] : memref<16x1xf32, #tpu.memory_space<vmem>>, vector<16x1xf32>
    %c0_3 = arith.constant 0 : index
    %c0_4 = arith.constant 0 : index
    %c0_5 = arith.constant 0 : index
    %2 = vector.load %arg2[%c0_3, %c0_4, %c0_5] : memref<8x8x256xf32, #tpu.memory_space<vmem>>, vector<1x8x256xf32>
    %3 = vector.shape_cast %2 : vector<1x8x256xf32> to vector<8x256xf32>
    %cst = arith.constant dense<0.000000e+00> : vector<16x256xf32>
    %4 = tpu.matmul %0, %3, %cst {dimension_numbers = #tpu.dot_dimension_numbers<[1], [0], [0], [1], [0, 0, 1, 1], [], []>} : vector<16x8xf32>, vector<8x256xf32>, vector<16x256xf32> -> vector<16x256xf32>
    %5 = vector.broadcast %1 : vector<16x1xf32> to vector<16x256xf32>
    %6 = arith.addf %4, %5 : vector<16x256xf32>
    %c0_6 = arith.constant 0 : index
    %c0_7 = arith.constant 0 : index
    %c0_8 = arith.constant 0 : index
    %7 = vector.load %arg5[%c0_6, %c0_7, %c0_8] : memref<8x16x256xf32, #tpu.memory_space<vmem>>, vector<1x16x256xf32>
    %8 = vector.shape_cast %7 : vector<1x16x256xf32> to vector<16x256xf32>
    %9 = vector.shape_cast %6 : vector<16x256xf32> to vector<1x16x256xf32>
    tpu.vector_store %arg5[%c0_6, %c0_7, %c0_8], %9 {strides = array<i32>} : memref<8x16x256xf32, #tpu.memory_space<vmem>>, vector<1x16x256xf32>,
    %c1 = arith.constant 1 : index
    %c0_9 = arith.constant 0 : index
    %c0_10 = arith.constant 0 : index
    %10 = vector.load %arg2[%c1, %c0_9, %c0_10] : memref<8x8x256xf32, #tpu.memory_space<vmem>>, vector<1x8x256xf32>
    %11 = vector.shape_cast %10 : vector<1x8x256xf32> to vector<8x256xf32>
    %cst_11 = arith.constant dense<0.000000e+00> : vector<16x256xf32>
    %12 = tpu.matmul %0, %11, %cst_11 {dimension_numbers = #tpu.dot_dimension_numbers<[1], [0], [0], [1], [0, 0, 1, 1], [], []>} : vector<16x8xf32>, vector<8x256xf32>, vector<16x256xf32> -> vector<16x256xf32>
    %13 = vector.broadcast %1 : vector<16x1xf32> to vector<16x256xf32>
    %14 = arith.addf %12, %13 : vector<16x256xf32>
    %c1_12 = arith.constant 1 : index
    %c0_13 = arith.constant 0 : index
    %c0_14 = arith.constant 0 : index
    %15 = vector.load %arg5[%c1_12, %c0_13, %c0_14] : memref<8x16x256xf32, #tpu.memory_space<vmem>>, vector<1x16x256xf32>
    %16 = vector.shape_cast %15 : vector<1x16x256xf32> to vector<16x256xf32>
    %17 = vector.shape_cast %14 : vector<16x256xf32> to vector<1x16x256xf32>
    tpu.vector_store %arg5[%c1_12, %c0_13, %c0_14], %17 {strides = array<i32>} : memref<8x16x256xf32, #tpu.memory_space<vmem>>, vector<1x16x256xf32>,
    %c2 = arith.constant 2 : index
    %c0_15 = arith.constant 0 : index
    %c0_16 = arith.constant 0 : index
    %18 = vector.load %arg2[%c2, %c0_15, %c0_16] : memref<8x8x256xf32, #tpu.memory_space<vmem>>, vector<1x8x256xf32>
    %19 = vector.shape_cast %18 : vector<1x8x256xf32> to vector<8x256xf32>
    %cst_17 = arith.constant dense<0.000000e+00> : vector<16x256xf32>
    %20 = tpu.matmul %0, %19, %cst_17 {dimension_numbers = #tpu.dot_dimension_numbers<[1], [0], [0], [1], [0, 0, 1, 1], [], []>} : vector<16x8xf32>, vector<8x256xf32>, vector<16x256xf32> -> vector<16x256xf32>
    %21 = vector.broadcast %1 : vector<16x1xf32> to vector<16x256xf32>
    %22 = arith.addf %20, %21 : vector<16x256xf32>
    %c2_18 = arith.constant 2 : index
    %c0_19 = arith.constant 0 : index
    %c0_20 = arith.constant 0 : index
    %23 = vector.load %arg5[%c2_18, %c0_19, %c0_20] : memref<8x16x256xf32, #tpu.memory_space<vmem>>, vector<1x16x256xf32>
    %24 = vector.shape_cast %23 : vector<1x16x256xf32> to vector<16x256xf32>
    %25 = vector.shape_cast %22 : vector<16x256xf32> to vector<1x16x256xf32>
    tpu.vector_store %arg5[%c2_18, %c0_19, %c0_20], %25 {strides = array<i32>} : memref<8x16x256xf32, #tpu.memory_space<vmem>>, vector<1x16x256xf32>,
    %c3 = arith.constant 3 : index
    %c0_21 = arith.constant 0 : index
    %c0_22 = arith.constant 0 : index
    %26 = vector.load %arg2[%c3, %c0_21, %c0_22] : memref<8x8x256xf32, #tpu.memory_space<vmem>>, vector<1x8x256xf32>
    %27 = vector.shape_cast %26 : vector<1x8x256xf32> to vector<8x256xf32>
    %cst_23 = arith.constant dense<0.000000e+00> : vector<16x256xf32>
    %28 = tpu.matmul %0, %27, %cst_23 {dimension_numbers = #tpu.dot_dimension_numbers<[1], [0], [0], [1], [0, 0, 1, 1], [], []>} : vector<16x8xf32>, vector<8x256xf32>, vector<16x256xf32> -> vector<16x256xf32>
    %29 = vector.broadcast %1 : vector<16x1xf32> to vector<16x256xf32>
    %30 = arith.addf %28, %29 : vector<16x256xf32>
    %c3_24 = arith.constant 3 : index
    %c0_25 = arith.constant 0 : index
    %c0_26 = arith.constant 0 : index
    %31 = vector.load %arg5[%c3_24, %c0_25, %c0_26] : memref<8x16x256xf32, #tpu.memory_space<vmem>>, vector<1x16x256xf32>
    %32 = vector.shape_cast %31 : vector<1x16x256xf32> to vector<16x256xf32>
    %33 = vector.shape_cast %30 : vector<16x256xf32> to vector<1x16x256xf32>
    tpu.vector_store %arg5[%c3_24, %c0_25, %c0_26], %33 {strides = array<i32>} : memref<8x16x256xf32, #tpu.memory_space<vmem>>, vector<1x16x256xf32>,
    %c4 = arith.constant 4 : index
    %c0_27 = arith.constant 0 : index
    %c0_28 = arith.constant 0 : index
    %34 = vector.load %arg2[%c4, %c0_27, %c0_28] : memref<8x8x256xf32, #tpu.memory_space<vmem>>, vector<1x8x256xf32>
    %35 = vector.shape_cast %34 : vector<1x8x256xf32> to vector<8x256xf32>
    %cst_29 = arith.constant dense<0.000000e+00> : vector<16x256xf32>
    %36 = tpu.matmul %0, %35, %cst_29 {dimension_numbers = #tpu.dot_dimension_numbers<[1], [0], [0], [1], [0, 0, 1, 1], [], []>} : vector<16x8xf32>, vector<8x256xf32>, vector<16x256xf32> -> vector<16x256xf32>
    %37 = vector.broadcast %1 : vector<16x1xf32> to vector<16x256xf32>
    %38 = arith.addf %36, %37 : vector<16x256xf32>
    %c4_30 = arith.constant 4 : index
    %c0_31 = arith.constant 0 : index
    %c0_32 = arith.constant 0 : index
    %39 = vector.load %arg5[%c4_30, %c0_31, %c0_32] : memref<8x16x256xf32, #tpu.memory_space<vmem>>, vector<1x16x256xf32>
    %40 = vector.shape_cast %39 : vector<1x16x256xf32> to vector<16x256xf32>
    %41 = vector.shape_cast %38 : vector<16x256xf32> to vector<1x16x256xf32>
    tpu.vector_store %arg5[%c4_30, %c0_31, %c0_32], %41 {strides = array<i32>} : memref<8x16x256xf32, #tpu.memory_space<vmem>>, vector<1x16x256xf32>,
    %c5 = arith.constant 5 : index
    %c0_33 = arith.constant 0 : index
    %c0_34 = arith.constant 0 : index
    %42 = vector.load %arg2[%c5, %c0_33, %c0_34] : memref<8x8x256xf32, #tpu.memory_space<vmem>>, vector<1x8x256xf32>
    %43 = vector.shape_cast %42 : vector<1x8x256xf32> to vector<8x256xf32>
    %cst_35 = arith.constant dense<0.000000e+00> : vector<16x256xf32>
    %44 = tpu.matmul %0, %43, %cst_35 {dimension_numbers = #tpu.dot_dimension_numbers<[1], [0], [0], [1], [0, 0, 1, 1], [], []>} : vector<16x8xf32>, vector<8x256xf32>, vector<16x256xf32> -> vector<16x256xf32>
    %45 = vector.broadcast %1 : vector<16x1xf32> to vector<16x256xf32>
    %46 = arith.addf %44, %45 : vector<16x256xf32>
    %c5_36 = arith.constant 5 : index
    %c0_37 = arith.constant 0 : index
    %c0_38 = arith.constant 0 : index
    %47 = vector.load %arg5[%c5_36, %c0_37, %c0_38] : memref<8x16x256xf32, #tpu.memory_space<vmem>>, vector<1x16x256xf32>
    %48 = vector.shape_cast %47 : vector<1x16x256xf32> to vector<16x256xf32>
    %49 = vector.shape_cast %46 : vector<16x256xf32> to vector<1x16x256xf32>
    tpu.vector_store %arg5[%c5_36, %c0_37, %c0_38], %49 {strides = array<i32>} : memref<8x16x256xf32, #tpu.memory_space<vmem>>, vector<1x16x256xf32>,
    %c6 = arith.constant 6 : index
    %c0_39 = arith.constant 0 : index
    %c0_40 = arith.constant 0 : index
    %50 = vector.load %arg2[%c6, %c0_39, %c0_40] : memref<8x8x256xf32, #tpu.memory_space<vmem>>, vector<1x8x256xf32>
    %51 = vector.shape_cast %50 : vector<1x8x256xf32> to vector<8x256xf32>
    %cst_41 = arith.constant dense<0.000000e+00> : vector<16x256xf32>
    %52 = tpu.matmul %0, %51, %cst_41 {dimension_numbers = #tpu.dot_dimension_numbers<[1], [0], [0], [1], [0, 0, 1, 1], [], []>} : vector<16x8xf32>, vector<8x256xf32>, vector<16x256xf32> -> vector<16x256xf32>
    %53 = vector.broadcast %1 : vector<16x1xf32> to vector<16x256xf32>
    %54 = arith.addf %52, %53 : vector<16x256xf32>
    %c6_42 = arith.constant 6 : index
    %c0_43 = arith.constant 0 : index
    %c0_44 = arith.constant 0 : index
    %55 = vector.load %arg5[%c6_42, %c0_43, %c0_44] : memref<8x16x256xf32, #tpu.memory_space<vmem>>, vector<1x16x256xf32>
    %56 = vector.shape_cast %55 : vector<1x16x256xf32> to vector<16x256xf32>
    %57 = vector.shape_cast %54 : vector<16x256xf32> to vector<1x16x256xf32>
    tpu.vector_store %arg5[%c6_42, %c0_43, %c0_44], %57 {strides = array<i32>} : memref<8x16x256xf32, #tpu.memory_space<vmem>>, vector<1x16x256xf32>,
    %c7 = arith.constant 7 : index
    %c0_45 = arith.constant 0 : index
    %c0_46 = arith.constant 0 : index
    %58 = vector.load %arg2[%c7, %c0_45, %c0_46] : memref<8x8x256xf32, #tpu.memory_space<vmem>>, vector<1x8x256xf32>
    %59 = vector.shape_cast %58 : vector<1x8x256xf32> to vector<8x256xf32>
    %cst_47 = arith.constant dense<0.000000e+00> : vector<16x256xf32>
    %60 = tpu.matmul %0, %59, %cst_47 {dimension_numbers = #tpu.dot_dimension_numbers<[1], [0], [0], [1], [0, 0, 1, 1], [], []>} : vector<16x8xf32>, vector<8x256xf32>, vector<16x256xf32> -> vector<16x256xf32>
    %61 = vector.broadcast %1 : vector<16x1xf32> to vector<16x256xf32>
    %62 = arith.addf %60, %61 : vector<16x256xf32>
    %c7_48 = arith.constant 7 : index
    %c0_49 = arith.constant 0 : index
    %c0_50 = arith.constant 0 : index
    %63 = vector.load %arg5[%c7_48, %c0_49, %c0_50] : memref<8x16x256xf32, #tpu.memory_space<vmem>>, vector<1x16x256xf32>
    %64 = vector.shape_cast %63 : vector<1x16x256xf32> to vector<16x256xf32>
    %65 = vector.shape_cast %62 : vector<16x256xf32> to vector<1x16x256xf32>
    tpu.vector_store %arg5[%c7_48, %c0_49, %c0_50], %65 {strides = array<i32>} : memref<8x16x256xf32, #tpu.memory_space<vmem>>, vector<1x16x256xf32>,
    return
  }
  func.func @transform_0(%arg0: i32, %arg1: i32) -> (i32, i32, i32) {
    %c0_i32 = arith.constant 0 : i32
    %c0_i32_0 = arith.constant 0 : i32
    return %arg0, %c0_i32, %arg1 : i32, i32, i32
  }
  func.func @transform_1(%arg0: i32, %arg1: i32) -> (i32, i32) {
    %c0_i32 = arith.constant 0 : i32
    %c0_i32_0 = arith.constant 0 : i32
    %c0_i32_1 = arith.constant 0 : i32
    return %c0_i32, %c0_i32_0 : i32, i32
  }
  func.func @transform_2(%arg0: i32, %arg1: i32) -> (i32, i32) {
    %c0_i32 = arith.constant 0 : i32
    %c0_i32_0 = arith.constant 0 : i32
    %c0_i32_1 = arith.constant 0 : i32
    return %c0_i32, %c0_i32_0 : i32, i32
  }
  func.func @transform_3(%arg0: i32, %arg1: i32) -> (i32, i32, i32) {
    %c0_i32 = arith.constant 0 : i32
    %c0_i32_0 = arith.constant 0 : i32
    return %arg0, %c0_i32, %arg1 : i32, i32, i32
  }
}

</mosaic_0001>

<bundles_post_ra>
// kernel: tpu_custom_call.1
= control target key start
LH: loop header
LB: loop body
LE: loop exit
PB: predicated region body
PF: predicated region fallthrough
CT: control target
= control target key end

     0   :  { %8 = vsyncpa [#allocation3], 0  ;;  %s952_s0 = inlined_call_operand.hbm [shape: f32[8,8,256], index: 0, kind: input, shape index: {}]   ;;  %s953_s1 = inlined_call_operand.vmem [shape: f32[16,8], index: 1, kind: input, shape index: {}]   ;;  %s954_s2 = inlined_call_operand.vmem [shape: f32[16,1], index: 2, kind: input, shape index: {}]   ;;  %s955_s3 = inlined_call_operand.hbm [shape: f32[8,16,256], index: 3, kind: output, shape index: {}]  }
   0x1   :  { %9 = vsyncpa [#allocation4], 0  ;;  %s816_s12 = smov [#allocation2]   ;;  %s768_s16 = scalar_lea.hbm %s952_s0, 2048 }
   0x2   :  { %s15_s13 = sshll.u32 %s816_s12, 4  ;;  %p769_p0 = scmp.ne.s32.totalorder %s952_s0, %s768_s16  ;;  %s16_s13 = int_to_ptr.vmem [resolvable:$true] %s15_s13 }
   0x3   :  { %p772_p1 = scmp.lt.u32.totalorder %s768_s16, %s952_s0 }
   0x5   :  { %p774_p2 = pnand %p772_p1, %p769_p0 }
   0x7   :  { %777 = shalt.err (!%p774_p2)
}
   0x8   :  { %s778_s21 = scalar_lea.vmem %s16_s13, 2048  ;;  %p783_p4 = scmp.lt.s32.totalorder %s16_s13, %s16_s13 }
   0x9   :  { %p779_p3 = scmp.ne.s32.totalorder %s16_s13, %s778_s21  ;;  %p784_p5 = scmp.lt.s32.totalorder %s778_s21, %s778_s21 }
   0xb   :  { %p785_p6 = por %p784_p5, %p783_p4 }
   0xd   :  { %p786_p7 = pnand %p785_p6, %p779_p3 }
   0xf   :  { %789 = shalt.err (!%p786_p7)
}
  0x10   :  { %s817_s22 = smov 256   ;;  %s818_s23 = smov 16  }
  0x11   :  { %21 = dma.hbm_to_vmem [thread:$0]  %s952_s0, 2048, %s16_s13, [#allocation3], %s817_s22, %s817_s22, %s818_s23  }
  0x12   :  { %812 = dma.done.wait [#allocation3], 2048  }
  0x13   :  { %813 = vsyncadd [#allocation3], 4294965248  ;;  %v819_v0 = vmov 0.0   ;;  %v820_v1 = vmov 0   ;;  %v34_v2 = vld [vmem:[#allocation2 + $0x8] sm:$0xff]  ;;  %v135_v3 = vld [vmem:[#allocation2 + $0x18] sm:$0xff] }
  0x14   :  { %116 = vmatprep.mubr.f32.mxu0 %v819_v0  ;;  %200 = vmatprep.mubr.f32.mxu1 %v819_v0  ;;  %v33_v4 = vld [vmem:[#allocation2] sm:$0xff]  ;;  %vm45_vm0 = vcmask 64512   ;;  %v134_v5 = vld [vmem:[#allocation2 + $0x10] sm:$0xff]  ;;  %v220_v7 = vld [vmem:[#allocation2 + $0x28] sm:$0xff] }
  0x15   :  { %767 = vset.pattern.permute.xlu0 %v820_v1  ;;  %52 = vmatprep.subr.mxu0 %v34_v2  ;;  %v29_v6 = vld [vmem:[%s953_s1] sm:$0xff]  ;;  %v305_v8 = vld [vmem:[#allocation2 + $0x38] sm:$0xff]  ;;  %v304_v10 = vld [vmem:[#allocation2 + $0x30] sm:$0xff] }
  0x16   :  { %136 = vmatprep.subr.mxu1 %v135_v3  ;;  %53 = vmatpush1.msra.mxu0 %v33_v4  ;;  %v219_v9 = vld [vmem:[#allocation2 + $0x20] sm:$0xff]  ;;  %v30_v11 = vld [vmem:[%s953_s1 + $0x8] sm:$0xff]  ;;  %v475_v13 = vld [vmem:[#allocation2 + $0x58] sm:$0xff] }
  0x17   :  { %137 = vmatpush1.msra.mxu1 %v134_v5  ;;  %745 = vmatmul.mubr.msk.f32.vlgmr.msra.gmra.mrb[0].mxu0 %vm45_vm0, %v29_v6  ;;  %v390_v12 = vld [vmem:[#allocation2 + $0x48] sm:$0xff]  ;;  %v31_v14 = vld [vmem:[%s954_s2] sm:$0xff]  ;;  %v474_v16 = vld [vmem:[#allocation2 + $0x50] sm:$0xff] }
  0x18   :  { %747 = vmatmul.mubr.msk.f32.vlgmr.msra.gmra.mrb[0].mxu1 %vm45_vm0, %v29_v6  ;;  %221 = vmatprep.subr.mxu0 %v220_v7  ;;  %v389_v15 = vld [vmem:[#allocation2 + $0x40] sm:$0xff]  ;;  %v560_v17 = vld [vmem:[#allocation2 + $0x68] sm:$0xff]  ;;  %v645_v18 = vld [vmem:[#allocation2 + $0x78] sm:$0xff] }
  0x19   :  { %306 = vmatprep.subr.mxu1 %v305_v8  ;;  %222 = vmatpush1.msra.mxu0 %v219_v9  ;;  %v32_v19 = vld [vmem:[%s954_s2 + $0x8] sm:$0xff]  ;;  %v559_v20 = vld [vmem:[#allocation2 + $0x60] sm:$0xff]  ;;  %v644_v21 = vld [vmem:[#allocation2 + $0x70] sm:$0xff]  ;;  %s821_s2 = smov [#allocation5]  }
  0x1a   :  { %307 = vmatpush1.msra.mxu1 %v304_v10  ;;  %122 = vmatprep.mubr.f32.mxu0 %v819_v0  ;;  %s733_s5 = sshll.u32 %s821_s2, 4  ;;  %s734_s5 = int_to_ptr.vmem [resolvable:$true] %s733_s5 }
  0x1b   :  { %206 = vmatprep.mubr.f32.mxu1 %v819_v0  ;;  %746 = vmatmul.mubr.msk.f32.gmra.mrb[2].mxu0 %vm45_vm0, %v30_v11  ;;  %s790_s6 = scalar_lea.vmem %s734_s5, 4096  ;;  %p795_p9 = scmp.lt.s32.totalorder %s734_s5, %s734_s5 }
  0x1c   :  { %748 = vmatmul.mubr.msk.f32.gmra.mrb[2].mxu1 %vm45_vm0, %v30_v11  ;;  %285 = vmatprep.mubr.f32.mxu0 %v819_v0  ;;  %p791_p8 = scmp.ne.s32.totalorder %s734_s5, %s790_s6  ;;  %p796_p10 = scmp.lt.s32.totalorder %s790_s6, %s790_s6 }
  0x1d   :  { %370 = vmatprep.mubr.f32.mxu1 %v819_v0  ;;  %391 = vmatprep.subr.mxu0 %v390_v12 }
  0x1e   :  { %476 = vmatprep.subr.mxu1 %v475_v13  ;;  %37 = vperm.xlu0 %767, %v31_v14   ;;  %p797_p11 = por %p796_p10, %p795_p9 }
  0x1f   :  { %749 = vmatmul.mubr.msk.f32.vlgmr.msra.gmra.mrb[4].mxu0 %vm45_vm0, %v29_v6 }
  0x20   :  { %751 = vmatmul.mubr.msk.f32.vlgmr.msra.gmra.mrb[4].mxu1 %vm45_vm0, %v29_v6  ;;  %392 = vmatpush1.msra.mxu0 %v389_v15  ;;  %p798_p12 = pnand %p797_p11, %p791_p8 }
  0x21   :  { %477 = vmatpush1.msra.mxu1 %v474_v16  ;;  %291 = vmatprep.mubr.f32.mxu0 %v819_v0 }
  0x22   :  { %376 = vmatprep.mubr.f32.mxu1 %v819_v0  ;;  %561 = vmatprep.subr.mxu0 %v560_v17 }
  0x23   :  { %646 = vmatprep.subr.mxu1 %v645_v18  ;;  %750 = vmatmul.mubr.msk.f32.gmra.mrb[6].mxu0 %vm45_vm0, %v30_v11 }
  0x24   :  { %752 = vmatmul.mubr.msk.f32.gmra.mrb[6].mxu1 %vm45_vm0, %v30_v11  ;;  %455 = vmatprep.mubr.f32.mxu0 %v819_v0 }
  0x25   :  { %540 = vmatprep.mubr.f32.mxu1 %v819_v0  ;;  %42 = vperm.xlu0 %767, %v32_v19  }
  0x27   :  { %753 = vmatmul.mubr.msk.f32.vlgmr.msra.gmra.mrb[8].mxu0 %vm45_vm0, %v29_v6 }
  0x28   :  { %755 = vmatmul.mubr.msk.f32.vlgmr.msra.gmra.mrb[8].mxu1 %vm45_vm0, %v29_v6  ;;  %562 = vmatpush1.msra.mxu0 %v559_v20 }
  0x29   :  { %647 = vmatpush1.msra.mxu1 %v644_v21  ;;  %461 = vmatprep.mubr.f32.mxu0 %v819_v0 }
  0x2a   :  { %546 = vmatprep.mubr.f32.mxu1 %v819_v0 }
  0x2b   :  { %754 = vmatmul.mubr.msk.f32.gmra.mrb[10].mxu0 %vm45_vm0, %v30_v11 }
  0x2c   :  { %756 = vmatmul.mubr.msk.f32.gmra.mrb[10].mxu1 %vm45_vm0, %v30_v11  ;;  %625 = vmatprep.mubr.f32.mxu0 %v819_v0 }
  0x2d   :  { %710 = vmatprep.mubr.f32.mxu1 %v819_v0 }
  0x2f   :  { %757 = vmatmul.mubr.msk.f32.vlgmr.msra.gmra.mrb[12].mxu0 %vm45_vm0, %v29_v6 }
  0x30   :  { %759 = vmatmul.mubr.msk.f32.vlgmr.msra.gmra.mrb[12].mxu1 %vm45_vm0, %v29_v6  ;;  %631 = vmatprep.mubr.f32.mxu0 %v819_v0 }
  0x31   :  { %716 = vmatprep.mubr.f32.mxu1 %v819_v0 }
  0x33   :  { %758 = vmatmul.mubr.msk.f32.gmra.mrb[14].mxu0 %vm45_vm0, %v30_v11 }
  0x34   :  { %760 = vmatmul.mubr.msk.f32.gmra.mrb[14].mxu1 %vm45_vm0, %v30_v11 }
  0x9d   :  { %v901_v22 = vpop.permute.xlu0 %37 }
  0xa4   :  { %v907_v31 = vpop.permute.xlu0 %42 }
  0xea   :  { %v118_v23 = vpop.f32.mrb[0].mxu0 }
  0xeb   :  { %v202_v24 = vpop.f32.mrb[0].mxu1  ;;  %v119_v25 = vadd.f32 %v118_v23, %v901_v22  ;;  %v120_v27 = vpop.f32.mrb[1].mxu0 }
  0xec   :  { %v203_v26 = vadd.f32 %v202_v24, %v901_v22  ;;  %v204_v28 = vpop.f32.mrb[1].mxu1  ;;  %v121_v29 = vadd.f32 %v120_v27, %v901_v22 }
  0xed   :  { %v205_v30 = vadd.f32 %v204_v28, %v901_v22  ;;  %129 = vst [vmem:[#allocation5] sm:$0xff] %v119_v25 }
  0xee   :  { %214 = vst [vmem:[#allocation5 + $0x20] sm:$0xff] %v203_v26  ;;  %130 = vst [vmem:[#allocation5 + $0x8] sm:$0xff] %v121_v29  ;;  %v124_v32 = vpop.f32.mrb[2].mxu0 }
  0xef   :  { %215 = vst [vmem:[#allocation5 + $0x28] sm:$0xff] %v205_v30  ;;  %v208_v33 = vpop.f32.mrb[2].mxu1  ;;  %v125_v34 = vadd.f32 %v124_v32, %v907_v31  ;;  %v126_v36 = vpop.f32.mrb[3].mxu0 }
  0xf0   :  { %v209_v35 = vadd.f32 %v208_v33, %v907_v31  ;;  %v210_v37 = vpop.f32.mrb[3].mxu1  ;;  %v127_v38 = vadd.f32 %v126_v36, %v907_v31 }
  0xf1   :  { %v211_v39 = vadd.f32 %v210_v37, %v907_v31  ;;  %131 = vst [vmem:[#allocation5 + $0x10] sm:$0xff] %v125_v34 }
  0xf2   :  { %216 = vst [vmem:[#allocation5 + $0x30] sm:$0xff] %v209_v35  ;;  %132 = vst [vmem:[#allocation5 + $0x18] sm:$0xff] %v127_v38  ;;  %v287_v40 = vpop.f32.mrb[4].mxu0 }
  0xf3   :  { %217 = vst [vmem:[#allocation5 + $0x38] sm:$0xff] %v211_v39  ;;  %v372_v41 = vpop.f32.mrb[4].mxu1  ;;  %v288_v42 = vadd.f32 %v287_v40, %v901_v22  ;;  %v289_v44 = vpop.f32.mrb[5].mxu0 }
  0xf4   :  { %v373_v43 = vadd.f32 %v372_v41, %v901_v22  ;;  %v374_v45 = vpop.f32.mrb[5].mxu1  ;;  %v290_v46 = vadd.f32 %v289_v44, %v901_v22 }
  0xf5   :  { %v375_v47 = vadd.f32 %v374_v45, %v901_v22  ;;  %299 = vst [vmem:[#allocation5 + $0x40] sm:$0xff] %v288_v42 }
  0xf6   :  { %384 = vst [vmem:[#allocation5 + $0x60] sm:$0xff] %v373_v43  ;;  %300 = vst [vmem:[#allocation5 + $0x48] sm:$0xff] %v290_v46  ;;  %v293_v48 = vpop.f32.mrb[6].mxu0 }
  0xf7   :  { %385 = vst [vmem:[#allocation5 + $0x68] sm:$0xff] %v375_v47  ;;  %v378_v49 = vpop.f32.mrb[6].mxu1  ;;  %v294_v50 = vadd.f32 %v293_v48, %v907_v31  ;;  %v295_v52 = vpop.f32.mrb[7].mxu0 }
  0xf8   :  { %v379_v51 = vadd.f32 %v378_v49, %v907_v31  ;;  %v380_v53 = vpop.f32.mrb[7].mxu1  ;;  %v296_v54 = vadd.f32 %v295_v52, %v907_v31 }
  0xf9   :  { %v381_v55 = vadd.f32 %v380_v53, %v907_v31  ;;  %301 = vst [vmem:[#allocation5 + $0x50] sm:$0xff] %v294_v50 }
  0xfa   :  { %386 = vst [vmem:[#allocation5 + $0x70] sm:$0xff] %v379_v51  ;;  %302 = vst [vmem:[#allocation5 + $0x58] sm:$0xff] %v296_v54  ;;  %v457_v56 = vpop.f32.mrb[8].mxu0 }
  0xfb   :  { %387 = vst [vmem:[#allocation5 + $0x78] sm:$0xff] %v381_v55  ;;  %v542_v57 = vpop.f32.mrb[8].mxu1  ;;  %v458_v58 = vadd.f32 %v457_v56, %v901_v22  ;;  %v459_v60 = vpop.f32.mrb[9].mxu0 }
  0xfc   :  { %v543_v59 = vadd.f32 %v542_v57, %v901_v22  ;;  %v544_v61 = vpop.f32.mrb[9].mxu1  ;;  %v460_v62 = vadd.f32 %v459_v60, %v901_v22 }
  0xfd   :  { %v545_v63 = vadd.f32 %v544_v61, %v901_v22  ;;  %469 = vst [vmem:[#allocation5 + $0x80] sm:$0xff] %v458_v58 }
  0xfe   :  { %554 = vst [vmem:[#allocation5 + $0xa0] sm:$0xff] %v543_v59  ;;  %470 = vst [vmem:[#allocation5 + $0x88] sm:$0xff] %v460_v62  ;;  %v463_v0 = vpop.f32.mrb[10].mxu0 }
  0xff   :  { %555 = vst [vmem:[#allocation5 + $0xa8] sm:$0xff] %v545_v63  ;;  %v548_v1 = vpop.f32.mrb[10].mxu1  ;;  %v464_v2 = vadd.f32 %v463_v0, %v907_v31  ;;  %v465_v4 = vpop.f32.mrb[11].mxu0 }
 0x100   :  { %v549_v3 = vadd.f32 %v548_v1, %v907_v31  ;;  %v550_v5 = vpop.f32.mrb[11].mxu1  ;;  %v466_v6 = vadd.f32 %v465_v4, %v907_v31 }
 0x101   :  { %v551_v7 = vadd.f32 %v550_v5, %v907_v31  ;;  %471 = vst [vmem:[#allocation5 + $0x90] sm:$0xff] %v464_v2 }
 0x102   :  { %556 = vst [vmem:[#allocation5 + $0xb0] sm:$0xff] %v549_v3  ;;  %472 = vst [vmem:[#allocation5 + $0x98] sm:$0xff] %v466_v6  ;;  %v627_v8 = vpop.f32.mrb[12].mxu0 }
 0x103   :  { %557 = vst [vmem:[#allocation5 + $0xb8] sm:$0xff] %v551_v7  ;;  %v712_v9 = vpop.f32.mrb[12].mxu1  ;;  %v628_v10 = vadd.f32 %v627_v8, %v901_v22  ;;  %v629_v12 = vpop.f32.mrb[13].mxu0 }
 0x104   :  { %v713_v11 = vadd.f32 %v712_v9, %v901_v22  ;;  %v714_v13 = vpop.f32.mrb[13].mxu1  ;;  %v630_v14 = vadd.f32 %v629_v12, %v901_v22 }
 0x105   :  { %v715_v15 = vadd.f32 %v714_v13, %v901_v22  ;;  %639 = vst [vmem:[#allocation5 + $0xc0] sm:$0xff] %v628_v10 }
 0x106   :  { %724 = vst [vmem:[#allocation5 + $0xe0] sm:$0xff] %v713_v11  ;;  %640 = vst [vmem:[#allocation5 + $0xc8] sm:$0xff] %v630_v14  ;;  %v633_v16 = vpop.f32.mrb[14].mxu0 }
 0x107   :  { %725 = vst [vmem:[#allocation5 + $0xe8] sm:$0xff] %v715_v15  ;;  %v718_v17 = vpop.f32.mrb[14].mxu1  ;;  %v634_v18 = vadd.f32 %v633_v16, %v907_v31  ;;  %v635_v20 = vpop.f32.mrb[15].mxu0 }
 0x108   :  { %v719_v19 = vadd.f32 %v718_v17, %v907_v31  ;;  %v720_v21 = vpop.f32.mrb[15].mxu1  ;;  %v636_v23 = vadd.f32 %v635_v20, %v907_v31 }
 0x109   :  { %v721_v24 = vadd.f32 %v720_v21, %v907_v31  ;;  %641 = vst [vmem:[#allocation5 + $0xd0] sm:$0xff] %v634_v18 }
 0x10a   :  { %726 = vst [vmem:[#allocation5 + $0xf0] sm:$0xff] %v719_v19  ;;  %642 = vst [vmem:[#allocation5 + $0xd8] sm:$0xff] %v636_v23 }
 0x10b   :  { %727 = vst [vmem:[#allocation5 + $0xf8] sm:$0xff] %v721_v24 }
 0x10c   :  { %801 = shalt.err (!%p798_p12)
}
 0x10d   :  { %s802_s9 = scalar_lea.hbm %s955_s3, 4096 }
 0x10e   :  { %p803_p13 = scmp.ne.s32.totalorder %s955_s3, %s802_s9  ;;  %p806_p0 = scmp.lt.u32.totalorder %s802_s9, %s955_s3 }
 0x110   :  { %p808_p1 = pnand %p806_p0, %p803_p13 }
 0x112   :  { %811 = shalt.err (!%p808_p1)
}
 0x113   :  { %739 = dma.vmem_to_hbm [thread:$0]  %s734_s5, 4096, %s955_s3, [#allocation4], %s817_s22, %s817_s22, %s818_s23  }
 0x114   :  { %814 = dma.done.wait [#allocation4], 4096  }
 0x115   :  { %815 = vsyncadd [#allocation4], 4294963200 }
 0x116   :  { %743 = vsyncpa [#allocation3], 1 }
 0x117   :  { %744 = vsyncpa [#allocation4], 1 }

</bundles_post_ra>
